<compile_context>
chip_gen: v5e
topology: v5e:2x2
jax: 0.10.0
libtpu: 0.0.40
codegen_flags: <defaults>
</compile_context>

<pallas_src>
import jax
import jax.numpy as jnp
from jax.experimental import pallas as pl
from jax.experimental.pallas import tpu as pltpu


def mlp_kernel(x_ref, w1t_ref, b1_ref, w2t_ref, b2_ref, o_ref):
    # x: [tB, C_in] bf16, w1t: [C_in, C_in] bf16, w2t: [C_in, C_out] bf16,
    # b1: [1, C_in] f32, b2: [1, C_out] f32.
    x = x_ref[...]
    # fc1 (PyTorch x @ W1.T already folded into the pre-transposed layout).
    h = jnp.dot(x, w1t_ref[...], preferred_element_type=jnp.float32)
    h = jnp.maximum(h + b1_ref[...], 0.0)            # bias + ReLU in f32 (VPU)
    # dropout is Identity (dropout=False) -> no-op
    h = h.astype(jnp.bfloat16)                       # bf16 MXU input for fc2
    # fc2
    y = jnp.dot(h, w2t_ref[...], preferred_element_type=jnp.float32)
    y = y + b2_ref[...]
    o_ref[...] = y.astype(o_ref.dtype)


def mlp_forward(x, w1, b1, w2, b2, *, tile_b=256):
    """y = relu(x @ w1.T + b1) @ w2.T + b2  (PyTorch nn.Linear convention).

    x:  [B, C_in]
    w1: [C_in, C_in], b1: [C_in]
    w2: [C_out, C_in], b2: [C_out]
    """
    B, C_in = x.shape
    C_out = w2.shape[0]

    # Wrapper-side layout plumbing (free in XLA): pre-transpose weights and
    # cast the matmul operands to bf16; biases stay f32 for the f32 epilogue.
    w1t = jnp.asarray(w1, dtype=jnp.bfloat16).T      # [C_in, C_in]
    w2t = jnp.asarray(w2, dtype=jnp.bfloat16).T      # [C_in, C_out]
    xb = x.astype(jnp.bfloat16)
    b1r = jnp.asarray(b1, dtype=jnp.float32).reshape(1, C_in)
    b2r = jnp.asarray(b2, dtype=jnp.float32).reshape(1, C_out)

    if B <= tile_b:
        # Single invocation, whole arrays in VMEM: no grid, no pipeline
        # prologue/epilogue overhead for this tiny problem.
        out_shape = jax.ShapeDtypeStruct((B, C_out), x.dtype)
        return pl.pallas_call(mlp_kernel, out_shape=out_shape)(
            xb, w1t, b1r, w2t, b2r)

    # Batch-tiled path: pad the batch to a multiple of tile_b so every grid
    # step sees a full tile, then grid over batch tiles. Weights/biases use
    # constant block indices so they are DMA'd once and stay resident in VMEM
    # while the batch axis amortizes them. "parallel" lets v7x shard the batch
    # axis across its two TensorCores.
    n_tiles = pl.cdiv(B, tile_b)
    B_pad = n_tiles * tile_b
    if B_pad != B:
        xb = jnp.pad(xb, ((0, B_pad - B), (0, 0)))

    out = pl.pallas_call(
        mlp_kernel,
        out_shape=jax.ShapeDtypeStruct((B_pad, C_out), x.dtype),
        grid=(n_tiles,),
        in_specs=[
            pl.BlockSpec((tile_b, C_in), lambda i: (i, 0)),
            pl.BlockSpec((C_in, C_in), lambda i: (0, 0)),
            pl.BlockSpec((1, C_in), lambda i: (0, 0)),
            pl.BlockSpec((C_in, C_out), lambda i: (0, 0)),
            pl.BlockSpec((1, C_out), lambda i: (0, 0)),
        ],
        out_specs=pl.BlockSpec((tile_b, C_out), lambda i: (i, 0)),
        compiler_params=pltpu.CompilerParams(
            dimension_semantics=("parallel",)),
    )(xb, w1t, b1r, w2t, b2r)

    return out[:B] if B_pad != B else out


if __name__ == "__main__":
    in_channels = 256
    out_channels = 8

    key = jax.random.PRNGKey(0)
    kx, kx2, k1, kb1, k2, kb2 = jax.random.split(key, 6)

    # Deterministic parameters (nn.Linear shapes: W [out, in], b [out]).
    w1 = jax.random.normal(k1, (in_channels, in_channels), dtype=jnp.float32) * 0.02
    b1 = jax.random.normal(kb1, (in_channels,), dtype=jnp.float32) * 0.02
    w2 = jax.random.normal(k2, (out_channels, in_channels), dtype=jnp.float32) * 0.02
    b2 = jax.random.normal(kb2, (out_channels,), dtype=jnp.float32) * 0.02

    def ref_mlp(x):
        # Reference with the same bf16 operand rounding + f32 accumulation.
        xb = x.astype(jnp.bfloat16).astype(jnp.float32)
        w1b = w1.astype(jnp.bfloat16).astype(jnp.float32)
        w2b = w2.astype(jnp.bfloat16).astype(jnp.float32)
        h = jnp.maximum(xb @ w1b.T + b1[None, :], 0.0)
        hb = h.astype(jnp.bfloat16).astype(jnp.float32)
        return hb @ w2b.T + b2[None, :]

    # 1) Small-batch path: single invocation, no grid.
    x_small = jax.random.normal(kx, (8, in_channels), dtype=jnp.float32)
    out_small = jax.block_until_ready(mlp_forward(x_small, w1, b1, w2, b2))
    assert out_small.shape == (8, out_channels)
    assert jnp.allclose(out_small, ref_mlp(x_small), atol=3e-3, rtol=3e-3)

    # 2) Batch-tiled path: 128-row tiles, weights resident in VMEM across tiles.
    x_big = jax.random.normal(kx2, (512, in_channels), dtype=jnp.float32)
    out_big = jax.block_until_ready(
        mlp_forward(x_big, w1, b1, w2, b2, tile_b=128))
    assert out_big.shape == (512, out_channels)
    assert jnp.allclose(out_big, ref_mlp(x_big), atol=3e-3, rtol=3e-3)

    print("KERNEL_OK")
</pallas_src>

<mosaic_0001>
module attributes {stable_mosaic.version = 11 : i64} {
  func.func @mlp_kernel(%arg0: memref<8x256xbf16, #tpu.memory_space<vmem>>, %arg1: memref<256x256xbf16, #tpu.memory_space<vmem>>, %arg2: memref<1x256xf32, #tpu.memory_space<vmem>>, %arg3: memref<256x8xbf16, #tpu.memory_space<vmem>>, %arg4: memref<1x8xf32, #tpu.memory_space<vmem>>, %arg5: memref<8x8xf32, #tpu.memory_space<vmem>>) attributes {dimension_semantics = [], scalar_prefetch = 0 : i64, scratch_operands = 0 : i64, tpu.core_type = #tpu.core_type<tc>} {
    %c0 = arith.constant 0 : index
    %c0_0 = arith.constant 0 : index
    %0 = vector.load %arg0[%c0, %c0_0] : memref<8x256xbf16, #tpu.memory_space<vmem>>, vector<8x256xbf16>
    %c0_1 = arith.constant 0 : index
    %c0_2 = arith.constant 0 : index
    %1 = vector.load %arg1[%c0_1, %c0_2] : memref<256x256xbf16, #tpu.memory_space<vmem>>, vector<256x256xbf16>
    %cst = arith.constant dense<0.000000e+00> : vector<8x256xf32>
    %2 = tpu.matmul %0, %1, %cst {dimension_numbers = #tpu.dot_dimension_numbers<[1], [0], [0], [1], [0, 0, 1, 1], [], []>} : vector<8x256xbf16>, vector<256x256xbf16>, vector<8x256xf32> -> vector<8x256xf32>
    %c0_3 = arith.constant 0 : index
    %c0_4 = arith.constant 0 : index
    %3 = vector.load %arg2[%c0_3, %c0_4] : memref<1x256xf32, #tpu.memory_space<vmem>>, vector<1x256xf32>
    %4 = vector.broadcast %3 : vector<1x256xf32> to vector<8x256xf32>
    %5 = arith.addf %2, %4 : vector<8x256xf32>
    %cst_5 = arith.constant 0.000000e+00 : f32
    %6 = vector.broadcast %cst_5 : f32 to vector<8x256xf32>
    %7 = arith.maximumf %5, %6 : vector<8x256xf32>
    %8 = arith.truncf %7 : vector<8x256xf32> to vector<8x256xbf16>
    %c0_6 = arith.constant 0 : index
    %c0_7 = arith.constant 0 : index
    %9 = vector.load %arg3[%c0_6, %c0_7] : memref<256x8xbf16, #tpu.memory_space<vmem>>, vector<256x8xbf16>
    %cst_8 = arith.constant dense<0.000000e+00> : vector<8x8xf32>
    %10 = tpu.matmul %8, %9, %cst_8 {dimension_numbers = #tpu.dot_dimension_numbers<[1], [0], [0], [1], [0, 0, 1, 1], [], []>} : vector<8x256xbf16>, vector<256x8xbf16>, vector<8x8xf32> -> vector<8x8xf32>
    %c0_9 = arith.constant 0 : index
    %c0_10 = arith.constant 0 : index
    %11 = vector.load %arg4[%c0_9, %c0_10] : memref<1x8xf32, #tpu.memory_space<vmem>>, vector<1x8xf32>
    %12 = vector.broadcast %11 : vector<1x8xf32> to vector<8x8xf32>
    %13 = arith.addf %10, %12 : vector<8x8xf32>
    %c0_11 = arith.constant 0 : index
    %c0_12 = arith.constant 0 : index
    %14 = vector.load %arg5[%c0_11, %c0_12] : memref<8x8xf32, #tpu.memory_space<vmem>>, vector<8x8xf32>
    tpu.vector_store %arg5[%c0_11, %c0_12], %13 {strides = array<i32>} : memref<8x8xf32, #tpu.memory_space<vmem>>, vector<8x8xf32>,
    return
  }
}

</mosaic_0001>

<bundles_post_ra>
// kernel: tpu_custom_call.1
= control target key start
LH: loop header
LB: loop body
LE: loop exit
PB: predicated region body
PF: predicated region fallthrough
CT: control target
= control target key end

     0   :  { %10 = vsyncpa [#allocation3], 0  ;;  %s870_s0 = inlined_call_operand.vmem [shape: bf16[8,256], index: 0, kind: input, shape index: {}]   ;;  %s871_s1 = inlined_call_operand.hbm [shape: bf16[256,256], index: 1, kind: input, shape index: {}]   ;;  %s872_s2 = inlined_call_operand.vmem [shape: f32[1,256], index: 2, kind: input, shape index: {}]   ;;  %s873_s3 = inlined_call_operand.vmem [shape: bf16[256,8], index: 3, kind: input, shape index: {}]   ;;  %s874_s4 = inlined_call_operand.vmem [shape: f32[1,8], index: 4, kind: input, shape index: {}]   ;;  %s875_s5 = inlined_call_operand.hbm [shape: f32[8,8], index: 5, kind: output, shape index: {}]  }
   0x1   :  { %11 = vsyncpa [#allocation4], 0  ;;  %s18_s20 = sshll.u32 %s871_s1, 4  ;;  %s773_s21 = smov [#allocation2]   ;;  %s19_s20 = int_to_ptr.hbm [resolvable:$true] %s18_s20 }
   0x2   :  { %s20_s22 = sshll.u32 %s773_s21, 4  ;;  %s774_s23 = smov 128   ;;  %s21_s22 = int_to_ptr.vmem [resolvable:$true] %s20_s22 }
   0x3   :  { %s775_s24 = smov 8  }
   0x4   :  { %26 = dma.hbm_to_vmem [thread:$0]  %s19_s20, 4096, %s21_s22, [#allocation3], %s774_s23, %s774_s23, %s775_s24  }
   0x5   :  { %769 = dma.done.wait [#allocation3], 4096  }
   0x6   :  { %770 = vsyncadd [#allocation3], 4294963200  ;;  %v534_v0 = vld [vmem:[#allocation2 + $0x70] sm:$0xf]  ;;  %v683_v1 = vld [vmem:[#allocation2 + $0x74] sm:$0xf0] }
   0x7   :  { %v598_v2 = vld [vmem:[#allocation2 + $0xf0] sm:$0xf]  ;;  %v535_v3 = vor.u32 %v683_v1, %v534_v0  ;;  %v699_v4 = vld [vmem:[#allocation2 + $0xf4] sm:$0xf0]  ;;  %v682_v5 = vld [vmem:[#allocation2 + $0x74] sm:$0xf] }
   0x8   :  { %v536_v6 = vld [vmem:[#allocation2 + $0x78] sm:$0xf0]  ;;  %v599_v7 = vor.u32 %v699_v4, %v598_v2  ;;  %v698_v9 = vld [vmem:[#allocation2 + $0xf4] sm:$0xf]  ;;  %v526_v11 = vld [vmem:[#allocation2 + $0x60] sm:$0xf] }
   0x9   :  { %v539_v8 = vor.u32 %v682_v5, %v536_v6  ;;  %v600_v10 = vld [vmem:[#allocation2 + $0xf8] sm:$0xf0]  ;;  %243 = vmatpush.bf16.msra.mxu0 %v535_v3  ;;  %v681_v13 = vld [vmem:[#allocation2 + $0x64] sm:$0xf0]  ;;  %v590_v14 = vld [vmem:[#allocation2 + $0xe0] sm:$0xf] }
   0xa   :  { %v603_v12 = vor.u32 %v698_v9, %v600_v10  ;;  %v697_v15 = vld [vmem:[#allocation2 + $0xe4] sm:$0xf0]  ;;  %256 = vmatpush.bf16.msra.mxu1 %v599_v7  ;;  %v527_v16 = vor.u32 %v681_v13, %v526_v11  ;;  %v680_v18 = vld [vmem:[#allocation2 + $0x64] sm:$0xf]  ;;  %v528_v19 = vld [vmem:[#allocation2 + $0x68] sm:$0xf0] }
   0xb   :  { %269 = vmatpush.bf16.msra.mxu2 %v539_v8  ;;  %v591_v17 = vor.u32 %v697_v15, %v590_v14  ;;  %v696_v20 = vld [vmem:[#allocation2 + $0xe4] sm:$0xf]  ;;  %v531_v21 = vor.u32 %v680_v18, %v528_v19  ;;  %v592_v22 = vld [vmem:[#allocation2 + $0xe8] sm:$0xf0]  ;;  %v518_v23 = vld [vmem:[#allocation2 + $0x50] sm:$0xf] }
   0xc   :  { %282 = vmatpush.bf16.msra.mxu3 %v603_v12  ;;  %v679_v24 = vld [vmem:[#allocation2 + $0x54] sm:$0xf0]  ;;  %v595_v25 = vor.u32 %v696_v20, %v592_v22  ;;  %v582_v26 = vld [vmem:[#allocation2 + $0xd0] sm:$0xf]  ;;  %v678_v28 = vld [vmem:[#allocation2 + $0x54] sm:$0xf] }
   0xd   :  { %v695_v27 = vld [vmem:[#allocation2 + $0xd4] sm:$0xf0]  ;;  %244 = vmatpush.bf16.msra.mxu0 %v527_v16  ;;  %v519_v29 = vor.u32 %v679_v24, %v518_v23  ;;  %v520_v30 = vld [vmem:[#allocation2 + $0x58] sm:$0xf0]  ;;  %v694_v31 = vld [vmem:[#allocation2 + $0xd4] sm:$0xf] }
   0xe   :  { %v584_v32 = vld [vmem:[#allocation2 + $0xd8] sm:$0xf0]  ;;  %257 = vmatpush.bf16.msra.mxu1 %v591_v17  ;;  %v583_v33 = vor.u32 %v695_v27, %v582_v26  ;;  %v523_v34 = vor.u32 %v678_v28, %v520_v30  ;;  %v510_v35 = vld [vmem:[#allocation2 + $0x40] sm:$0xf]  ;;  %v677_v36 = vld [vmem:[#allocation2 + $0x44] sm:$0xf0] }
   0xf   :  { %270 = vmatpush.bf16.msra.mxu2 %v531_v21  ;;  %v574_v37 = vld [vmem:[#allocation2 + $0xc0] sm:$0xf]  ;;  %v587_v38 = vor.u32 %v694_v31, %v584_v32  ;;  %v693_v39 = vld [vmem:[#allocation2 + $0xc4] sm:$0xf0]  ;;  %v676_v40 = vld [vmem:[#allocation2 + $0x44] sm:$0xf]  ;;  %v511_v44 = vor.u32 %v677_v36, %v510_v35 }
  0x10   :  { %283 = vmatpush.bf16.msra.mxu3 %v595_v25  ;;  %v512_v41 = vld [vmem:[#allocation2 + $0x48] sm:$0xf0]  ;;  %v692_v42 = vld [vmem:[#allocation2 + $0xc4] sm:$0xf]  ;;  %v575_v45 = vor.u32 %v693_v39, %v574_v37  ;;  %v502_v47 = vld [vmem:[#allocation2 + $0x30] sm:$0xf] }
  0x11   :  { %v576_v43 = vld [vmem:[#allocation2 + $0xc8] sm:$0xf0]  ;;  %245 = vmatpush.bf16.msra.mxu0 %v519_v29  ;;  %v515_v46 = vor.u32 %v676_v40, %v512_v41  ;;  %v675_v48 = vld [vmem:[#allocation2 + $0x34] sm:$0xf0]  ;;  %v566_v49 = vld [vmem:[#allocation2 + $0xb0] sm:$0xf] }
  0x12   :  { %258 = vmatpush.bf16.msra.mxu1 %v583_v33  ;;  %v579_v50 = vor.u32 %v692_v42, %v576_v43  ;;  %v691_v51 = vld [vmem:[#allocation2 + $0xb4] sm:$0xf0]  ;;  %v674_v52 = vld [vmem:[#allocation2 + $0x34] sm:$0xf]  ;;  %v504_v53 = vld [vmem:[#allocation2 + $0x38] sm:$0xf0]  ;;  %v503_v56 = vor.u32 %v675_v48, %v502_v47 }
  0x13   :  { %271 = vmatpush.bf16.msra.mxu2 %v523_v34  ;;  %v690_v54 = vld [vmem:[#allocation2 + $0xb4] sm:$0xf]  ;;  %v568_v55 = vld [vmem:[#allocation2 + $0xb8] sm:$0xf0]  ;;  %v567_v57 = vor.u32 %v691_v51, %v566_v49  ;;  %v507_v58 = vor.u32 %v674_v52, %v504_v53  ;;  %v494_v59 = vld [vmem:[#allocation2 + $0x20] sm:$0xf] }
  0x14   :  { %284 = vmatpush.bf16.msra.mxu3 %v587_v38  ;;  %v673_v60 = vld [vmem:[#allocation2 + $0x24] sm:$0xf0]  ;;  %v558_v61 = vld [vmem:[#allocation2 + $0xa0] sm:$0xf]  ;;  %v571_v62 = vor.u32 %v690_v54, %v568_v55  ;;  %v672_v0 = vld [vmem:[#allocation2 + $0x24] sm:$0xf] }
  0x15   :  { %246 = vmatpush.bf16.msra.mxu0 %v511_v44  ;;  %v689_v63 = vld [vmem:[#allocation2 + $0xa4] sm:$0xf0]  ;;  %v496_v1 = vld [vmem:[#allocation2 + $0x28] sm:$0xf0]  ;;  %v688_v2 = vld [vmem:[#allocation2 + $0xa4] sm:$0xf]  ;;  %v495_v4 = vor.u32 %v673_v60, %v494_v59 }
  0x16   :  { %259 = vmatpush.bf16.msra.mxu1 %v575_v45  ;;  %v560_v3 = vld [vmem:[#allocation2 + $0xa8] sm:$0xf0]  ;;  %v559_v5 = vor.u32 %v689_v63, %v558_v61  ;;  %v499_v6 = vor.u32 %v672_v0, %v496_v1  ;;  %v486_v7 = vld [vmem:[#allocation2 + $0x10] sm:$0xf]  ;;  %v671_v8 = vld [vmem:[#allocation2 + $0x14] sm:$0xf0] }
  0x17   :  { %272 = vmatpush.bf16.msra.mxu2 %v515_v46  ;;  %v550_v9 = vld [vmem:[#allocation2 + $0x90] sm:$0xf]  ;;  %v563_v10 = vor.u32 %v688_v2, %v560_v3  ;;  %v687_v11 = vld [vmem:[#allocation2 + $0x94] sm:$0xf0]  ;;  %v670_v12 = vld [vmem:[#allocation2 + $0x14] sm:$0xf]  ;;  %v487_v16 = vor.u32 %v671_v8, %v486_v7 }
  0x18   :  { %285 = vmatpush.bf16.msra.mxu3 %v579_v50  ;;  %v488_v13 = vld [vmem:[#allocation2 + $0x18] sm:$0xf0]  ;;  %v686_v14 = vld [vmem:[#allocation2 + $0x94] sm:$0xf]  ;;  %v478_v17 = vld [vmem:[#allocation2] sm:$0xf]  ;;  %v551_v19 = vor.u32 %v687_v11, %v550_v9 }
  0x19   :  { %247 = vmatpush.bf16.msra.mxu0 %v503_v56  ;;  %v552_v15 = vld [vmem:[#allocation2 + $0x98] sm:$0xf0]  ;;  %v37_v18 = vld [vmem:[%s870_s0] sm:$0xff]  ;;  %v491_v20 = vor.u32 %v670_v12, %v488_v13  ;;  %v669_v21 = vld [vmem:[#allocation2 + $0x4] sm:$0xf0]  ;;  %s776_s7 = smov [#allocation5]  }
  0x1a   :  { %260 = vmatpush.bf16.msra.mxu1 %v567_v57  ;;  %v542_v22 = vld [vmem:[#allocation2 + $0x80] sm:$0xf]  ;;  %v685_v23 = vld [vmem:[#allocation2 + $0x84] sm:$0xf0]  ;;  %v555_v24 = vor.u32 %v686_v14, %v552_v15  ;;  %v668_v25 = vld [vmem:[#allocation2 + $0x4] sm:$0xf]  ;;  %v77_v29 = vunpack.c.l.b16 %v37_v18  ;;  %v479_v30 = vor.u32 %v669_v21, %v478_v17  ;;  %v78_v31 = vunpack.c.h.b16 %v37_v18 }
  0x1b   :  { %273 = vmatpush.bf16.msra.mxu2 %v507_v58  ;;  %v480_v26 = vld [vmem:[#allocation2 + $0x8] sm:$0xf0]  ;;  %v684_v27 = vld [vmem:[#allocation2 + $0x84] sm:$0xf]  ;;  %v543_v32 = vor.u32 %v685_v23, %v542_v22  ;;  %v707_v35 = vld [vmem:[%s873_s3 + $0x38] sm:$0xff]  ;;  %s464_s8 = sshll.u32 %s776_s7, 4  ;;  %s465_s8 = int_to_ptr.vmem [resolvable:$true] %s464_s8 }
  0x1c   :  { %286 = vmatpush.bf16.msra.mxu3 %v571_v62  ;;  %v544_v28 = vld [vmem:[#allocation2 + $0x88] sm:$0xf0]  ;;  %v483_v33 = vor.u32 %v668_v25, %v480_v26  ;;  %v79_v36 = vpack.c.b16 %v77_v29, %v77_v29  ;;  %v715_v37 = vld [vmem:[%s873_s3 + $0x78] sm:$0xff]  ;;  %v80_v38 = vpack.c.b16 %v78_v31, %v78_v31  ;;  %v706_v39 = vld [vmem:[%s873_s3 + $0x30] sm:$0xff]  ;;  %s466_s11 = sshll.u32 %s875_s5, 4  ;;  %vm457_vm0 = vcmask 64512   ;;  %s467_s11 = int_to_ptr.hbm [resolvable:$true] %s466_s11 }
  0x1d   :  { %248 = vmatpush.bf16.msra.mxu0 %v495_v4  ;;  %v547_v34 = vor.u32 %v684_v27, %v544_v28  ;;  %v714_v40 = vld [vmem:[%s873_s3 + $0x70] sm:$0xff]  ;;  %v705_v41 = vld [vmem:[%s873_s3 + $0x28] sm:$0xff]  ;;  %v704_v43 = vld [vmem:[%s873_s3 + $0x20] sm:$0xff] }
  0x1e   :  { %261 = vmatpush.bf16.msra.mxu1 %v559_v5  ;;  %v713_v42 = vld [vmem:[%s873_s3 + $0x68] sm:$0xff]  ;;  %v712_v44 = vld [vmem:[%s873_s3 + $0x60] sm:$0xff]  ;;  %v703_v45 = vld [vmem:[%s873_s3 + $0x18] sm:$0xff] }
  0x1f   :  { %274 = vmatpush.bf16.msra.mxu2 %v499_v6  ;;  %v702_v46 = vld [vmem:[%s873_s3 + $0x10] sm:$0xff]  ;;  %v711_v47 = vld [vmem:[%s873_s3 + $0x58] sm:$0xff]  ;;  %v701_v48 = vld [vmem:[%s873_s3 + $0x8] sm:$0xff] }
  0x20   :  { %287 = vmatpush.bf16.msra.mxu3 %v563_v10  ;;  %v710_v49 = vld [vmem:[%s873_s3 + $0x50] sm:$0xff]  ;;  %v700_v50 = vld [vmem:[%s873_s3] sm:$0xff]  ;;  %v709_v51 = vld [vmem:[%s873_s3 + $0x48] sm:$0xff] }
  0x21   :  { %249 = vmatpush.bf16.msra.mxu0 %v487_v16  ;;  %v708_v52 = vld [vmem:[%s873_s3 + $0x40] sm:$0xff] }
  0x22   :  { %262 = vmatpush.bf16.msra.mxu1 %v551_v19  ;;  %v70_v53 = vld [vmem:[%s872_s2] sm:$0x3] }
  0x23   :  { %275 = vmatpush.bf16.msra.mxu2 %v491_v20  ;;  %v72_v54 = vperm.slane %v70_v53, 0  ;;  %v73_v59 = vperm.slane %v70_v53, 1  ;;  %v720_v8 = vld [vmem:[%s874_s4] ss:$0 sm:$0xff] }
  0x24   :  { %288 = vmatpush.bf16.msra.mxu3 %v555_v24 }
  0x25   :  { %250 = vmatpush.bf16.msra.mxu0 %v479_v30 }
  0x26   :  { %263 = vmatpush.bf16.msra.mxu1 %v543_v32 }
  0x27   :  { %276 = vmatpush.bf16.msra.mxu2 %v483_v33 }
  0x28   :  { %289 = vmatpush.bf16.msra.mxu3 %v547_v34  ;;  %251 = vmatmul.bf16.vlgmr.msra.gmra.mxu0 %v79_v36 }
  0x29   :  { %431 = vmatpush.bf16.msrb.mxu0 %v707_v35  ;;  %264 = vmatmul.bf16.vlgmr.msra.gmra.mxu1 %v80_v38 }
  0x2a   :  { %444 = vmatpush.bf16.msrb.mxu1 %v715_v37  ;;  %277 = vmatmul.bf16.vlgmr.msra.gmra.mxu2 %v79_v36 }
  0x2b   :  { %290 = vmatmul.bf16.vlgmr.msra.gmra.mxu3 %v80_v38 }
  0x2d   :  { %432 = vmatpush.bf16.msrb.mxu0 %v706_v39 }
  0x2e   :  { %445 = vmatpush.bf16.msrb.mxu1 %v714_v40 }
  0x31   :  { %433 = vmatpush.bf16.msrb.mxu0 %v705_v41 }
  0x32   :  { %446 = vmatpush.bf16.msrb.mxu1 %v713_v42 }
  0x35   :  { %434 = vmatpush.bf16.msrb.mxu0 %v704_v43 }
  0x36   :  { %447 = vmatpush.bf16.msrb.mxu1 %v712_v44 }
  0x39   :  { %435 = vmatpush.bf16.msrb.mxu0 %v703_v45 }
  0x3a   :  { %448 = vmatpush.bf16.msrb.mxu1 %v711_v47 }
  0x3d   :  { %436 = vmatpush.bf16.msrb.mxu0 %v702_v46 }
  0x3e   :  { %449 = vmatpush.bf16.msrb.mxu1 %v710_v49 }
  0x41   :  { %437 = vmatpush.bf16.msrb.mxu0 %v701_v48 }
  0x42   :  { %450 = vmatpush.bf16.msrb.mxu1 %v709_v51 }
  0x45   :  { %438 = vmatpush.bf16.msrb.mxu0 %v700_v50 }
  0x46   :  { %451 = vmatpush.bf16.msrb.mxu1 %v708_v52 }
  0xa5   :  { %v252_v55 = vpop.f32.mrf.mxu0 }
  0xa6   :  { %v253_v56 = vadd.f32 %v252_v55, %v72_v54  ;;  %v265_v57 = vpop.f32.mrf.mxu1 }
  0xa8   :  { %v266_v58 = vadd.f32 %v265_v57, %v253_v56 }
  0xaa   :  { %v295_v60 = vmax.f32 %v266_v58, 0.0 }
  0xac   :  { %v297_v61 = vpack.c.bf16 %v295_v60, %v295_v60 }
  0xad   :  { %v278_v62 = vpop.f32.mrf.mxu2  ;;  %v254_v1 = vpop.f32.mrf.mxu0 }
  0xae   :  { %v279_v63 = vadd.f32 %v278_v62, %v73_v59  ;;  %v291_v0 = vpop.f32.mrf.mxu3  ;;  %v267_v2 = vpop.f32.mrf.mxu1  ;;  %439 = vmatmul.bf16.vlgmr.msrb.gmra.mxu0 %v297_v61 }
  0xb0   :  { %v292_v3 = vadd.f32 %v291_v0, %v279_v63 }
  0xb2   :  { %v296_v4 = vmax.f32 %v292_v3, 0.0 }
  0xb4   :  { %v298_v5 = vpack.c.bf16 %v296_v4, %v296_v4 }
  0xb5   :  { %v280_v6 = vpop.f32.mrf.mxu2 }
  0xb6   :  { %v293_v7 = vpop.f32.mrf.mxu3  ;;  %452 = vmatmul.bf16.vlgmr.msrb.gmra.mxu1 %v298_v5 }
 0x12b   :  { %v440_v9 = vpop.f32.mrf.mxu0 }
 0x12c   :  { %v441_v10 = vadd.f32 %v720_v8, %v440_v9 }
 0x133   :  { %v453_v11 = vpop.f32.mrf.mxu1  ;;  %v442_v13 = vpop.f32.mrf.mxu0 }
 0x134   :  { %v454_v12 = vadd.f32 %v453_v11, %v441_v10 }
 0x136   :  { %458 = vst.msk [vmem:[#allocation5] sm:$0xff] %vm457_vm0, %v454_v12 }
 0x137   :  { %469 = dma.vmem_to_hbm [thread:$0]  %s465_s8, 128, %s467_s11, [#allocation4]  }
 0x13b   :  { %v455_v14 = vpop.f32.mrf.mxu1 }
 0x13c   :  { %771 = dma.done.wait [#allocation4], 128  }
 0x13d   :  { %772 = vsyncadd [#allocation4], 4294967168 }
 0x13e   :  { %474 = vsyncpa [#allocation3], 1 }
 0x13f   :  { %475 = vsyncpa [#allocation4], 1 }

</bundles_post_ra>
